<compile_context>
chip_gen: v5e
topology: v5e:2x2
jax: 0.10.0
libtpu: 0.0.40
codegen_flags: <defaults>
</compile_context>

<pallas_src>
import functools
import math

import numpy as np
import jax
import jax.numpy as jnp
from jax import lax
from jax.experimental import pallas as pl
from jax.experimental.pallas import tpu as pltpu


# ---------------------------------------------------------------------------
# VMEM budget (generation aware) and tile selection
# ---------------------------------------------------------------------------
@functools.lru_cache(maxsize=None)
def _vmem_limit_bytes():
    try:
        cap = pltpu.get_tpu_info().vmem_capacity_bytes
        return int(max(32 << 20, min(int(0.75 * cap), 96 << 20)))
    except Exception:
        return 64 << 20


def _pick_tile(total, target):
    """Largest tile <= target dividing `total`, preferring 16/8-aligned sizes.

    Falls back to the full dimension (always a legal block) rather than a
    ragged tile; pad T upstream for pathological (prime) sequence lengths.
    """
    if total <= target:
        return total
    for align in (16, 8):
        start = (target // align) * align
        for t in range(start, align - 1, -align):
            if total % t == 0:
                return t
    return total


def _const_spec(shape):
    """BlockSpec for an operand whose block never changes: constant index map,
    single-buffered (pl.Buffered(1)) to halve its VMEM residency."""
    idx = lambda *_: (0,) * len(shape)
    try:
        return pl.BlockSpec(shape, idx, pipeline_mode=pl.Buffered(1))
    except Exception:  # older JAX without pipeline_mode: fall back to default
        return pl.BlockSpec(shape, idx)


# ---------------------------------------------------------------------------
# Pallas kernels
# ---------------------------------------------------------------------------
def _qkv_kernel(n_head, eps, h_ref, g_ref, b_ref, w_ref, bqkv_ref,
                q_ref, k_ref, v_ref):
    """LN1 + fused QKV projection (Conv1D) for one (batch, token-tile) block.

    h_ref: (1, tq, D) f32.  w_ref: (D, 3D) bf16 with the 1/sqrt(hd) attention
    scale already folded into the q columns (host-side).
    Outputs q/k/v: (1, H, tq, hd) bf16, head-major — k/v double as `present`.
    """
    x = h_ref[0]                                       # (tq, D)
    D = x.shape[-1]
    hd = D // n_head

    mu = jnp.mean(x, axis=-1, keepdims=True)
    xc = x - mu
    var = jnp.mean(xc * xc, axis=-1, keepdims=True)
    h1 = xc * lax.rsqrt(var + eps) * g_ref[...] + b_ref[...]

    qkv = jnp.dot(h1.astype(jnp.bfloat16), w_ref[...],
                  preferred_element_type=jnp.float32) + bqkv_ref[...]

    # Split heads on the write path (once per token tile, amortized over all
    # key-tile re-reads in the attention kernel).
    for hh in range(n_head):
        q_ref[0, hh] = qkv[:, 0 * D + hh * hd:0 * D + (hh + 1) * hd].astype(q_ref.dtype)
        k_ref[0, hh] = qkv[:, 1 * D + hh * hd:1 * D + (hh + 1) * hd].astype(k_ref.dtype)
        v_ref[0, hh] = qkv[:, 2 * D + hh * hd:2 * D + (hh + 1) * hd].astype(v_ref.dtype)


def _attn_mlp_kernel(n_head, eps, is_sparse, stride, c,
                     x_ref, q_ref, k_ref, v_ref,
                     pw_ref, pb_ref, g2_ref, b2_ref,
                     fcw_ref, fcb_ref, mpw_ref, mpb_ref,
                     o_ref,
                     m_scr, l_scr, acc_scr):
    """Flash-style masked attention over key tiles + c_proj + LN2 + MLP.

    Grid = (B, num_q_tiles, num_k_tiles); key-tile axis innermost (reduction).
    Online-softmax state lives in VMEM scratch:
      m_scr, l_scr : (H, tq, 1) running max / denominator
      acc_scr      : (H, tq, hd) un-normalized attention output
    The mask is generated in-kernel; fully-masked causal key tiles are skipped.
    The projection / residual / LN2 / MLP epilogue runs on the last key tile.
    """
    i = pl.program_id(1)
    j = pl.program_id(2)
    nk = pl.num_programs(2)
    H = q_ref.shape[1]
    tq = q_ref.shape[2]
    hd = q_ref.shape[3]
    tk = k_ref.shape[2]
    D = H * hd

    @pl.when(j == 0)
    def _init():
        m_scr[...] = jnp.full(m_scr.shape, -jnp.inf, dtype=m_scr.dtype)
        l_scr[...] = jnp.zeros(l_scr.shape, dtype=l_scr.dtype)
        acc_scr[...] = jnp.zeros(acc_scr.shape, dtype=acc_scr.dtype)

    # Skip key tiles that are entirely above the causal diagonal for every
    # query row of this q-tile (all masks here are causal).
    @pl.when(j * tk < (i + 1) * tq)
    def _compute():
        q = q_ref[0]                               # (H, tq, hd) bf16, pre-scaled
        k = k_ref[0]                               # (H, tk, hd) bf16
        v = v_ref[0]                               # (H, tk, hd) bf16

        # In-kernel additive mask bias: 0 on visible, -1e10 on masked.
        q_pos = i * tq + lax.broadcasted_iota(jnp.int32, (tq, tk), 0)
        k_pos = j * tk + lax.broadcasted_iota(jnp.int32, (tq, tk), 1)
        visible = k_pos <= q_pos
        if is_sparse:
            col_vis = (k_pos % stride) >= (stride - c)
            blk_vis = (k_pos // stride) == (q_pos // stride)
            visible = jnp.logical_and(visible, jnp.logical_or(col_vis, blk_vis))
        bias = jnp.where(visible, 0.0, -1e10).astype(jnp.float32)

        # Head-batched score / value contractions (single MXU stream, no
        # per-head lane-sliced scratch RMWs).
        s = jnp.einsum('hqd,hkd->hqk', q, k,
                       preferred_element_type=jnp.float32)      # (H, tq, tk)
        s = s + bias[None, :, :]

        m_prev = m_scr[...]                                     # (H, tq, 1)
        m_new = jnp.maximum(m_prev, jnp.max(s, axis=-1, keepdims=True))
        alpha = jnp.exp(m_prev - m_new)
        p = jnp.exp(s - m_new)
        l_scr[...] = alpha * l_scr[...] + jnp.sum(p, axis=-1, keepdims=True)
        pv = jnp.einsum('hqk,hkd->hqd', p.astype(jnp.bfloat16), v,
                        preferred_element_type=jnp.float32)     # (H, tq, hd)
        acc_scr[...] = alpha * acc_scr[...] + pv
        m_scr[...] = m_new

    @pl.when(j == nk - 1)
    def _finish():
        # Normalize with one broadcast multiply (EUP approximate reciprocal).
        a = acc_scr[...] * pl.reciprocal(l_scr[...], approx=True)   # (H, tq, hd)

        # c_proj fused with the head merge:
        #   concat_h(a_h) @ W  ==  sum_h  a_h @ W[h*hd:(h+1)*hd, :]
        attn = jnp.zeros((tq, D), jnp.float32)
        for hh in range(n_head):
            attn = attn + jnp.dot(a[hh].astype(jnp.bfloat16),
                                  pw_ref[hh * hd:(hh + 1) * hd, :],
                                  preferred_element_type=jnp.float32)
        h1 = attn + pb_ref[...] + x_ref[0]                     # residual

        # LN2 (fp32 statistics)
        mu = jnp.mean(h1, axis=-1, keepdims=True)
        hc = h1 - mu
        var = jnp.mean(hc * hc, axis=-1, keepdims=True)
        h2 = hc * lax.rsqrt(var + eps) * g2_ref[...] + b2_ref[...]

        # MLP: fc -> exact erf GELU (matches nn.GELU()) -> proj, residual
        f = jnp.dot(h2.astype(jnp.bfloat16), fcw_ref[...],
                    preferred_element_type=jnp.float32) + fcb_ref[...]
        f = 0.5 * f * (1.0 + lax.erf(f * (1.0 / math.sqrt(2.0))))
        f = jnp.dot(f.astype(jnp.bfloat16), mpw_ref[...],
                    preferred_element_type=jnp.float32) + mpb_ref[...]
        o_ref[0] = (f + h1).astype(o_ref.dtype)


def _ln_kernel(eps, x_ref, g_ref, b_ref, o_ref):
    x = x_ref[0]
    mu = jnp.mean(x, axis=-1, keepdims=True)
    xc = x - mu
    var = jnp.mean(xc * xc, axis=-1, keepdims=True)
    o_ref[0] = xc * lax.rsqrt(var + eps) * g_ref[...] + b_ref[...]


# ---------------------------------------------------------------------------
# Wrappers around pallas_call
# ---------------------------------------------------------------------------
def qkv_forward(h, bp, n_head, eps, tq):
    B, T, D = h.shape
    hd = D // n_head
    assert T % tq == 0
    nq = T // tq

    # Fold the 1/sqrt(head_dim) attention scale into the q-slice of the QKV
    # weight AND bias (free at trace time; removes the in-kernel multiply).
    qscale = jnp.concatenate(
        [jnp.full((D,), 1.0 / math.sqrt(hd), jnp.float32),
         jnp.ones((2 * D,), jnp.float32)])
    w = (bp['attn_w'] * qscale[None, :]).astype(jnp.bfloat16)
    bqkv = bp['attn_b'] * qscale[None, :]

    kern = functools.partial(_qkv_kernel, n_head, eps)
    q, k, v = pl.pallas_call(
        kern,
        grid=(B, nq),
        in_specs=[
            pl.BlockSpec((1, tq, D), lambda b, i: (b, i, 0)),
            _const_spec((1, D)),          # ln1 gamma
            _const_spec((1, D)),          # ln1 beta
            _const_spec((D, 3 * D)),      # qkv weight (bf16, q-scaled)
            _const_spec((1, 3 * D)),      # qkv bias   (q-scaled)
        ],
        out_specs=(
            pl.BlockSpec((1, n_head, tq, hd), lambda b, i: (b, 0, i, 0)),
            pl.BlockSpec((1, n_head, tq, hd), lambda b, i: (b, 0, i, 0)),
            pl.BlockSpec((1, n_head, tq, hd), lambda b, i: (b, 0, i, 0)),
        ),
        out_shape=(
            jax.ShapeDtypeStruct((B, n_head, T, hd), jnp.bfloat16),  # q (scaled)
            jax.ShapeDtypeStruct((B, n_head, T, hd), jnp.bfloat16),  # k
            jax.ShapeDtypeStruct((B, n_head, T, hd), jnp.bfloat16),  # v
        ),
        compiler_params=pltpu.CompilerParams(
            dimension_semantics=("parallel", "parallel"),
            vmem_limit_bytes=_vmem_limit_bytes()),
    )(h, bp['ln1_g'], bp['ln1_b'], w, bqkv)
    return q, k, v


def attn_mlp_forward(h, q, k, v, bp, n_head, eps, is_sparse, stride, c, tq, tk):
    B, T, D = h.shape
    hd = D // n_head
    assert T % tq == 0 and T % tk == 0
    nq, nk = T // tq, T // tk
    kern = functools.partial(_attn_mlp_kernel, n_head, eps, is_sparse, stride, c)

    # Advisory cost estimate so XLA schedules surrounding ops around this call.
    flops = int(4 * B * T * T * D            # scores + p@v (upper bound)
                + 2 * B * T * D * D          # attention output projection
                + 16 * B * T * D * D)        # MLP fc + proj
    transcendentals = int(B * n_head * T * T + B * T * 4 * D)
    bytes_accessed = int(2 * B * T * D * 4                    # x in + out (f32)
                         + 2 * B * T * D                      # q (bf16)
                         + 2 * nq * 2 * B * T * D             # k,v re-read per q tile
                         + 2 * (D * D + 8 * D * D))           # weights (bf16)

    return pl.pallas_call(
        kern,
        grid=(B, nq, nk),                 # key-tile (reduction) axis innermost
        in_specs=[
            pl.BlockSpec((1, tq, D), lambda b, i, j: (b, i, 0)),              # residual in
            pl.BlockSpec((1, n_head, tq, hd), lambda b, i, j: (b, 0, i, 0)),  # q tile
            pl.BlockSpec((1, n_head, tk, hd), lambda b, i, j: (b, 0, j, 0)),  # k tile
            pl.BlockSpec((1, n_head, tk, hd), lambda b, i, j: (b, 0, j, 0)),  # v tile
            _const_spec((D, D)),          # attn proj W (bf16)
            _const_spec((1, D)),          # attn proj b
            _const_spec((1, D)),          # ln2 gamma
            _const_spec((1, D)),          # ln2 beta
            _const_spec((D, 4 * D)),      # fc W (bf16)
            _const_spec((1, 4 * D)),      # fc b
            _const_spec((4 * D, D)),      # mlp proj W (bf16)
            _const_spec((1, D)),          # mlp proj b
        ],
        out_specs=pl.BlockSpec((1, tq, D), lambda b, i, j: (b, i, 0)),
        out_shape=jax.ShapeDtypeStruct((B, T, D), h.dtype),
        scratch_shapes=[
            pltpu.VMEM((n_head, tq, 1), jnp.float32),    # running max
            pltpu.VMEM((n_head, tq, 1), jnp.float32),    # running denominator
            pltpu.VMEM((n_head, tq, hd), jnp.float32),   # output accumulator
        ],
        input_output_aliases={0: 0},      # h -> block output (drop one HBM buf)
        cost_estimate=pl.CostEstimate(flops=flops,
                                      transcendentals=transcendentals,
                                      bytes_accessed=bytes_accessed),
        compiler_params=pltpu.CompilerParams(
            dimension_semantics=("parallel", "parallel", "arbitrary"),
            vmem_limit_bytes=_vmem_limit_bytes()),
    )(h, q, k, v,
      bp['attn_pw'].astype(jnp.bfloat16), bp['attn_pb'],
      bp['ln2_g'], bp['ln2_b'],
      bp['fc_w'].astype(jnp.bfloat16), bp['fc_b'],
      bp['mp_w'].astype(jnp.bfloat16), bp['mp_b'])


def layernorm_forward(x, g, b, eps, tq):
    B, T, D = x.shape
    assert T % tq == 0
    nq = T // tq
    return pl.pallas_call(
        functools.partial(_ln_kernel, eps),
        grid=(B, nq),
        in_specs=[
            pl.BlockSpec((1, tq, D), lambda bb, i: (bb, i, 0)),
            _const_spec((1, D)),
            _const_spec((1, D)),
        ],
        out_specs=pl.BlockSpec((1, tq, D), lambda bb, i: (bb, i, 0)),
        out_shape=jax.ShapeDtypeStruct((B, T, D), x.dtype),
        compiler_params=pltpu.CompilerParams(
            dimension_semantics=("parallel", "parallel"),
            vmem_limit_bytes=_vmem_limit_bytes()),
    )(x, g, b)


# ---------------------------------------------------------------------------
# Model assembly (glue in plain JAX)
# ---------------------------------------------------------------------------
def dense_mask(nd, ns):
    return jnp.asarray(np.tril(np.ones((nd, ns), np.float32), k=ns - nd))


def sparse_mask(nd, ns, stride, c):
    layout = np.zeros((ns, ns), np.float32)
    for idx in range(c):
        layout[:, stride - 1 - idx::stride] = 1
    for q_idx in range(ns):
        row = q_idx // stride
        layout[q_idx, row * stride:(row + 1) * stride] = 1
        layout[q_idx, q_idx + 1:] = 0
    return jnp.asarray(layout[ns - nd:])


def build_masks(cfg, T):
    masks = []
    for i in range(cfg['n_layer']):
        if cfg['mode'] == 'sparse' and i % 2 != 0:
            masks.append(sparse_mask(T, T, cfg['stride'], cfg['c']))
        else:
            masks.append(dense_mask(T, T))
    return masks


def init_params(key, cfg):
    D = cfg['n_embd']
    L = cfg['n_layer']
    proj_std = 0.02 * (1.0 / math.sqrt(2 * L))
    k = key

    def nxt():
        nonlocal k
        k, sub = jax.random.split(k)
        return sub

    params = {
        'wte': jax.random.normal(nxt(), (cfg['n_vocab'], D), jnp.float32),
        'wpe': jax.random.normal(nxt(), (cfg['n_ctx'], D), jnp.float32),
        'blocks': [],
        'ln_f_g': jnp.ones((1, D), jnp.float32),
        'ln_f_b': jnp.zeros((1, D), jnp.float32),
    }
    for _ in range(L):
        params['blocks'].append({
            'ln1_g': jnp.ones((1, D), jnp.float32),
            'ln1_b': jnp.zeros((1, D), jnp.float32),
            'attn_w': 0.02 * jax.random.normal(nxt(), (D, 3 * D), jnp.float32),
            'attn_b': jnp.zeros((1, 3 * D), jnp.float32),
            'attn_pw': proj_std * jax.random.normal(nxt(), (D, D), jnp.float32),
            'attn_pb': jnp.zeros((1, D), jnp.float32),
            'ln2_g': jnp.ones((1, D), jnp.float32),
            'ln2_b': jnp.zeros((1, D), jnp.float32),
            'fc_w': 0.02 * jax.random.normal(nxt(), (D, 4 * D), jnp.float32),
            'fc_b': jnp.zeros((1, 4 * D), jnp.float32),
            'mp_w': proj_std * jax.random.normal(nxt(), (4 * D, D), jnp.float32),
            'mp_b': jnp.zeros((1, D), jnp.float32),
        })
    return params


def linglong_forward(params, input_ids, cfg, tq=None, tk=None):
    """Forward pass (past=None).  Returns hidden_states and present."""
    B, T = input_ids.shape
    D = cfg['n_embd']
    H = cfg['n_head']
    hd = D // H
    L = cfg['n_layer']
    eps = cfg['epsilon']

    # Tile defaults scale with the device VMEM limit (v7x 48 MiB vs 96 MiB).
    lim = _vmem_limit_bytes()
    if tq is None:
        tq = _pick_tile(T, 256 if lim >= (80 << 20) else 128)
    if tk is None:
        tk = _pick_tile(T, 512 if lim >= (80 << 20) else 256)

    pos = jnp.arange(T)
    h = jnp.take(params['wte'], input_ids, axis=0) \
        + jnp.take(params['wpe'], pos, axis=0)[None, :, :]
    # embd / attn / resid dropout are identity (p=0 / inference).

    ks, vs = [], []
    for i, bp in enumerate(params['blocks']):
        is_sparse = (cfg['mode'] == 'sparse') and (i % 2 != 0)
        q, kf, vf = qkv_forward(h, bp, H, eps, tq)
        ks.append(kf)
        vs.append(vf)
        h = attn_mlp_forward(h, q, kf, vf, bp, H, eps,
                             is_sparse, cfg.get('stride'), cfg.get('c'), tq, tk)

    h = layernorm_forward(h, params['ln_f_g'], params['ln_f_b'], eps, tq)

    # `present`: k/v already come out head-major (B, H, T, hd) bf16; one stack
    # + transpose + f32 upcast at the very end.
    k_all = jnp.stack(ks, axis=0)                        # (L, B, H, T, hd)
    v_all = jnp.stack(vs, axis=0)
    kv = jnp.stack([k_all, v_all], axis=1)               # (L, 2, B, H, T, hd)
    present = kv.transpose(2, 0, 1, 3, 4, 5).astype(jnp.float32)
    return {'hidden_states': h, 'present': present}      # (B, L, 2, H, T, hd)


# ---------------------------------------------------------------------------
# Pure-JAX fp32 reference (mirrors the PyTorch forward) for verification
# ---------------------------------------------------------------------------
def ref_forward(params, masks, input_ids, cfg):
    D = cfg['n_embd']
    n_head = cfg['n_head']
    hd = D // n_head
    eps = cfg['epsilon']
    B, T = input_ids.shape
    P = lax.Precision.HIGHEST

    def ln(x, g, b):
        mu = x.mean(-1, keepdims=True)
        xc = x - mu
        var = (xc * xc).mean(-1, keepdims=True)
        return xc * lax.rsqrt(var + eps) * g + b

    h = params['wte'][input_ids] + params['wpe'][jnp.arange(T)][None]
    presents = []
    for i, p in enumerate(params['blocks']):
        mask = masks[i]
        h1 = ln(h, p['ln1_g'], p['ln1_b'])
        qkv = jnp.dot(h1, p['attn_w'], precision=P) + p['attn_b']
        q, k, v = jnp.split(qkv, 3, axis=-1)
        sh = lambda x: x.reshape(B, T, n_head, hd).transpose(0, 2, 1, 3)
        qh, kh, vh = sh(q), sh(k), sh(v)
        presents.append(jnp.stack([kh, vh], axis=1))
        s = jnp.einsum('bhqd,bhkd->bhqk', qh, kh, precision=P) / (hd ** 0.5)
        s = s * mask - 1e10 * (1.0 - mask)
        w = jax.nn.softmax(s, axis=-1)
        a = jnp.einsum('bhqk,bhkd->bhqd', w, vh, precision=P)
        a = a.transpose(0, 2, 1, 3).reshape(B, T, D)
        a = jnp.dot(a, p['attn_pw'], precision=P) + p['attn_pb']
        h1r = a + h
        h2 = ln(h1r, p['ln2_g'], p['ln2_b'])
        f = jnp.dot(h2, p['fc_w'], precision=P) + p['fc_b']
        f = 0.5 * f * (1.0 + lax.erf(f / math.sqrt(2.0)))
        f = jnp.dot(f, p['mp_w'], precision=P) + p['mp_b']
        h = f + h1r
    present = jnp.stack(presents, axis=1)
    h = ln(h, params['ln_f_g'], params['ln_f_b'])
    return {'hidden_states': h, 'present': present}


# ---------------------------------------------------------------------------
if __name__ == "__main__":
    cfg = dict(n_vocab=64, n_ctx=16, n_embd=32, n_head=4, n_layer=2,
               epsilon=1e-5, mode='sparse', stride=4, c=1,
               attn_dropout=0.0, resid_dropout=0.0, embd_dropout=0.0)
    B, T = 2, 8

    key = jax.random.PRNGKey(0)
    pkey, ikey = jax.random.split(key)
    params = init_params(pkey, cfg)
    input_ids = jax.random.randint(ikey, (B, T), 0, cfg['n_vocab'], dtype=jnp.int32)

    out = linglong_forward(params, input_ids, cfg)
    jax.block_until_ready(out)

    masks = build_masks(cfg, T)
    ref = ref_forward(params, masks, input_ids, cfg)
    # bf16 MXU inputs / bf16 K-V cache / approx reciprocal vs fp32 reference.
    np.testing.assert_allclose(np.asarray(out['hidden_states']),
                               np.asarray(ref['hidden_states']),
                               atol=2e-2, rtol=2e-2)
    np.testing.assert_allclose(np.asarray(out['present']),
                               np.asarray(ref['present']),
                               atol=2e-2, rtol=2e-2)
    print("KERNEL_OK")
</pallas_src>

<mosaic_0001>
module attributes {stable_mosaic.version = 11 : i64} {
  func.func @_qkv_kernel(%arg0: i32, %arg1: i32, %arg2: memref<1x8x32xf32, #tpu.memory_space<vmem>>, %arg3: memref<1x32xf32, #tpu.memory_space<vmem>>, %arg4: memref<1x32xf32, #tpu.memory_space<vmem>>, %arg5: memref<32x96xbf16, #tpu.memory_space<vmem>>, %arg6: memref<1x96xf32, #tpu.memory_space<vmem>>, %arg7: memref<1x4x8x8xbf16, #tpu.memory_space<vmem>>, %arg8: memref<1x4x8x8xbf16, #tpu.memory_space<vmem>>, %arg9: memref<1x4x8x8xbf16, #tpu.memory_space<vmem>>) attributes {dimension_semantics = [#tpu.dimension_semantics<parallel>, #tpu.dimension_semantics<parallel>], iteration_bounds = array<i64: 2, 1>, scalar_prefetch = 0 : i64, scratch_operands = 0 : i64, tpu.core_type = #tpu.core_type<tc>, window_params = [{transform_indices = @transform_0, window_bounds = array<i64: 1, 8, 32>}, {pipeline_mode = #tpu.pipeline_mode<synchronous>, transform_indices = @transform_1, window_bounds = array<i64: 1, 32>}, {pipeline_mode = #tpu.pipeline_mode<synchronous>, transform_indices = @transform_2, window_bounds = array<i64: 1, 32>}, {pipeline_mode = #tpu.pipeline_mode<synchronous>, transform_indices = @transform_3, window_bounds = array<i64: 32, 96>}, {pipeline_mode = #tpu.pipeline_mode<synchronous>, transform_indices = @transform_4, window_bounds = array<i64: 1, 96>}, {transform_indices = @transform_5, window_bounds = array<i64: 1, 4, 8, 8>}, {transform_indices = @transform_6, window_bounds = array<i64: 1, 4, 8, 8>}, {transform_indices = @transform_7, window_bounds = array<i64: 1, 4, 8, 8>}]} {
    %c0 = arith.constant 0 : index
    %c0_0 = arith.constant 0 : index
    %c0_1 = arith.constant 0 : index
    %0 = vector.load %arg2[%c0, %c0_0, %c0_1] : memref<1x8x32xf32, #tpu.memory_space<vmem>>, vector<1x8x32xf32>
    %1 = vector.shape_cast %0 : vector<1x8x32xf32> to vector<8x32xf32>
    %cst = arith.constant dense<0.000000e+00> : vector<8xf32>
    %2 = vector.multi_reduction <add>, %1, %cst [1] : vector<8x32xf32> to vector<8xf32>
    %3 = vector.shape_cast %2 : vector<8xf32> to vector<8x1xf32>
    %cst_2 = arith.constant 3.200000e+01 : f32
    %4 = vector.broadcast %cst_2 : f32 to vector<8x1xf32>
    %5 = arith.divf %3, %4 : vector<8x1xf32>
    %6 = vector.broadcast %5 : vector<8x1xf32> to vector<8x32xf32>
    %7 = arith.subf %1, %6 : vector<8x32xf32>
    %8 = arith.mulf %7, %7 : vector<8x32xf32>
    %cst_3 = arith.constant dense<0.000000e+00> : vector<8xf32>
    %9 = vector.multi_reduction <add>, %8, %cst_3 [1] : vector<8x32xf32> to vector<8xf32>
    %10 = vector.shape_cast %9 : vector<8xf32> to vector<8x1xf32>
    %cst_4 = arith.constant 3.200000e+01 : f32
    %11 = vector.broadcast %cst_4 : f32 to vector<8x1xf32>
    %12 = arith.divf %10, %11 : vector<8x1xf32>
    %cst_5 = arith.constant 9.99999974E-6 : f32
    %13 = vector.broadcast %cst_5 : f32 to vector<8x1xf32>
    %14 = arith.addf %12, %13 : vector<8x1xf32>
    %15 = math.rsqrt %14 : vector<8x1xf32>
    %16 = vector.broadcast %15 : vector<8x1xf32> to vector<8x32xf32>
    %17 = arith.mulf %7, %16 : vector<8x32xf32>
    %c0_6 = arith.constant 0 : index
    %c0_7 = arith.constant 0 : index
    %18 = vector.load %arg3[%c0_6, %c0_7] : memref<1x32xf32, #tpu.memory_space<vmem>>, vector<1x32xf32>
    %19 = vector.broadcast %18 : vector<1x32xf32> to vector<8x32xf32>
    %20 = arith.mulf %17, %19 : vector<8x32xf32>
    %c0_8 = arith.constant 0 : index
    %c0_9 = arith.constant 0 : index
    %21 = vector.load %arg4[%c0_8, %c0_9] : memref<1x32xf32, #tpu.memory_space<vmem>>, vector<1x32xf32>
    %22 = vector.broadcast %21 : vector<1x32xf32> to vector<8x32xf32>
    %23 = arith.addf %20, %22 : vector<8x32xf32>
    %24 = arith.truncf %23 : vector<8x32xf32> to vector<8x32xbf16>
    %c0_10 = arith.constant 0 : index
    %c0_11 = arith.constant 0 : index
    %25 = vector.load %arg5[%c0_10, %c0_11] : memref<32x96xbf16, #tpu.memory_space<vmem>>, vector<32x96xbf16>
    %cst_12 = arith.constant dense<0.000000e+00> : vector<8x96xf32>
    %26 = tpu.matmul %24, %25, %cst_12 {dimension_numbers = #tpu.dot_dimension_numbers<[1], [0], [0], [1], [0, 0, 1, 1], [], []>} : vector<8x32xbf16>, vector<32x96xbf16>, vector<8x96xf32> -> vector<8x96xf32>
    %c0_13 = arith.constant 0 : index
    %c0_14 = arith.constant 0 : index
    %27 = vector.load %arg6[%c0_13, %c0_14] : memref<1x96xf32, #tpu.memory_space<vmem>>, vector<1x96xf32>
    %28 = vector.broadcast %27 : vector<1x96xf32> to vector<8x96xf32>
    %29 = arith.addf %26, %28 : vector<8x96xf32>
    %30 = vector.extract_strided_slice %29 {offsets = [0, 0], sizes = [8, 8], strides = [1, 1]} : vector<8x96xf32> to vector<8x8xf32>
    %31 = arith.truncf %30 : vector<8x8xf32> to vector<8x8xbf16>
    %c0_15 = arith.constant 0 : index
    %c0_16 = arith.constant 0 : index
    %c0_17 = arith.constant 0 : index
    %c0_18 = arith.constant 0 : index
    %32 = vector.load %arg7[%c0_15, %c0_16, %c0_17, %c0_18] : memref<1x4x8x8xbf16, #tpu.memory_space<vmem>>, vector<1x1x8x8xbf16>
    %33 = vector.shape_cast %32 : vector<1x1x8x8xbf16> to vector<8x8xbf16>
    %34 = vector.shape_cast %31 : vector<8x8xbf16> to vector<1x1x8x8xbf16>
    tpu.vector_store %arg7[%c0_15, %c0_16, %c0_17, %c0_18], %34 {strides = array<i32>} : memref<1x4x8x8xbf16, #tpu.memory_space<vmem>>, vector<1x1x8x8xbf16>,
    %35 = vector.extract_strided_slice %29 {offsets = [0, 32], sizes = [8, 8], strides = [1, 1]} : vector<8x96xf32> to vector<8x8xf32>
    %36 = arith.truncf %35 : vector<8x8xf32> to vector<8x8xbf16>
    %c0_19 = arith.constant 0 : index
    %c0_20 = arith.constant 0 : index
    %c0_21 = arith.constant 0 : index
    %c0_22 = arith.constant 0 : index
    %37 = vector.load %arg8[%c0_19, %c0_20, %c0_21, %c0_22] : memref<1x4x8x8xbf16, #tpu.memory_space<vmem>>, vector<1x1x8x8xbf16>
    %38 = vector.shape_cast %37 : vector<1x1x8x8xbf16> to vector<8x8xbf16>
    %39 = vector.shape_cast %36 : vector<8x8xbf16> to vector<1x1x8x8xbf16>
    tpu.vector_store %arg8[%c0_19, %c0_20, %c0_21, %c0_22], %39 {strides = array<i32>} : memref<1x4x8x8xbf16, #tpu.memory_space<vmem>>, vector<1x1x8x8xbf16>,
    %40 = vector.extract_strided_slice %29 {offsets = [0, 64], sizes = [8, 8], strides = [1, 1]} : vector<8x96xf32> to vector<8x8xf32>
    %41 = arith.truncf %40 : vector<8x8xf32> to vector<8x8xbf16>
    %c0_23 = arith.constant 0 : index
    %c0_24 = arith.constant 0 : index
    %c0_25 = arith.constant 0 : index
    %c0_26 = arith.constant 0 : index
    %42 = vector.load %arg9[%c0_23, %c0_24, %c0_25, %c0_26] : memref<1x4x8x8xbf16, #tpu.memory_space<vmem>>, vector<1x1x8x8xbf16>
    %43 = vector.shape_cast %42 : vector<1x1x8x8xbf16> to vector<8x8xbf16>
    %44 = vector.shape_cast %41 : vector<8x8xbf16> to vector<1x1x8x8xbf16>
    tpu.vector_store %arg9[%c0_23, %c0_24, %c0_25, %c0_26], %44 {strides = array<i32>} : memref<1x4x8x8xbf16, #tpu.memory_space<vmem>>, vector<1x1x8x8xbf16>,
    %45 = vector.extract_strided_slice %29 {offsets = [0, 8], sizes = [8, 8], strides = [1, 1]} : vector<8x96xf32> to vector<8x8xf32>
    %46 = arith.truncf %45 : vector<8x8xf32> to vector<8x8xbf16>
    %c0_27 = arith.constant 0 : index
    %c1 = arith.constant 1 : index
    %c0_28 = arith.constant 0 : index
    %c0_29 = arith.constant 0 : index
    %47 = vector.load %arg7[%c0_27, %c1, %c0_28, %c0_29] : memref<1x4x8x8xbf16, #tpu.memory_space<vmem>>, vector<1x1x8x8xbf16>
    %48 = vector.shape_cast %47 : vector<1x1x8x8xbf16> to vector<8x8xbf16>
    %49 = vector.shape_cast %46 : vector<8x8xbf16> to vector<1x1x8x8xbf16>
    tpu.vector_store %arg7[%c0_27, %c1, %c0_28, %c0_29], %49 {strides = array<i32>} : memref<1x4x8x8xbf16, #tpu.memory_space<vmem>>, vector<1x1x8x8xbf16>,
    %50 = vector.extract_strided_slice %29 {offsets = [0, 40], sizes = [8, 8], strides = [1, 1]} : vector<8x96xf32> to vector<8x8xf32>
    %51 = arith.truncf %50 : vector<8x8xf32> to vector<8x8xbf16>
    %c0_30 = arith.constant 0 : index
    %c1_31 = arith.constant 1 : index
    %c0_32 = arith.constant 0 : index
    %c0_33 = arith.constant 0 : index
    %52 = vector.load %arg8[%c0_30, %c1_31, %c0_32, %c0_33] : memref<1x4x8x8xbf16, #tpu.memory_space<vmem>>, vector<1x1x8x8xbf16>
    %53 = vector.shape_cast %52 : vector<1x1x8x8xbf16> to vector<8x8xbf16>
    %54 = vector.shape_cast %51 : vector<8x8xbf16> to vector<1x1x8x8xbf16>
    tpu.vector_store %arg8[%c0_30, %c1_31, %c0_32, %c0_33], %54 {strides = array<i32>} : memref<1x4x8x8xbf16, #tpu.memory_space<vmem>>, vector<1x1x8x8xbf16>,
    %55 = vector.extract_strided_slice %29 {offsets = [0, 72], sizes = [8, 8], strides = [1, 1]} : vector<8x96xf32> to vector<8x8xf32>
    %56 = arith.truncf %55 : vector<8x8xf32> to vector<8x8xbf16>
    %c0_34 = arith.constant 0 : index
    %c1_35 = arith.constant 1 : index
    %c0_36 = arith.constant 0 : index
    %c0_37 = arith.constant 0 : index
    %57 = vector.load %arg9[%c0_34, %c1_35, %c0_36, %c0_37] : memref<1x4x8x8xbf16, #tpu.memory_space<vmem>>, vector<1x1x8x8xbf16>
    %58 = vector.shape_cast %57 : vector<1x1x8x8xbf16> to vector<8x8xbf16>
    %59 = vector.shape_cast %56 : vector<8x8xbf16> to vector<1x1x8x8xbf16>
    tpu.vector_store %arg9[%c0_34, %c1_35, %c0_36, %c0_37], %59 {strides = array<i32>} : memref<1x4x8x8xbf16, #tpu.memory_space<vmem>>, vector<1x1x8x8xbf16>,
    %60 = vector.extract_strided_slice %29 {offsets = [0, 16], sizes = [8, 8], strides = [1, 1]} : vector<8x96xf32> to vector<8x8xf32>
    %61 = arith.truncf %60 : vector<8x8xf32> to vector<8x8xbf16>
    %c0_38 = arith.constant 0 : index
    %c2 = arith.constant 2 : index
    %c0_39 = arith.constant 0 : index
    %c0_40 = arith.constant 0 : index
    %62 = vector.load %arg7[%c0_38, %c2, %c0_39, %c0_40] : memref<1x4x8x8xbf16, #tpu.memory_space<vmem>>, vector<1x1x8x8xbf16>
    %63 = vector.shape_cast %62 : vector<1x1x8x8xbf16> to vector<8x8xbf16>
    %64 = vector.shape_cast %61 : vector<8x8xbf16> to vector<1x1x8x8xbf16>
    tpu.vector_store %arg7[%c0_38, %c2, %c0_39, %c0_40], %64 {strides = array<i32>} : memref<1x4x8x8xbf16, #tpu.memory_space<vmem>>, vector<1x1x8x8xbf16>,
    %65 = vector.extract_strided_slice %29 {offsets = [0, 48], sizes = [8, 8], strides = [1, 1]} : vector<8x96xf32> to vector<8x8xf32>
    %66 = arith.truncf %65 : vector<8x8xf32> to vector<8x8xbf16>
    %c0_41 = arith.constant 0 : index
    %c2_42 = arith.constant 2 : index
    %c0_43 = arith.constant 0 : index
    %c0_44 = arith.constant 0 : index
    %67 = vector.load %arg8[%c0_41, %c2_42, %c0_43, %c0_44] : memref<1x4x8x8xbf16, #tpu.memory_space<vmem>>, vector<1x1x8x8xbf16>
    %68 = vector.shape_cast %67 : vector<1x1x8x8xbf16> to vector<8x8xbf16>
    %69 = vector.shape_cast %66 : vector<8x8xbf16> to vector<1x1x8x8xbf16>
    tpu.vector_store %arg8[%c0_41, %c2_42, %c0_43, %c0_44], %69 {strides = array<i32>} : memref<1x4x8x8xbf16, #tpu.memory_space<vmem>>, vector<1x1x8x8xbf16>,
    %70 = vector.extract_strided_slice %29 {offsets = [0, 80], sizes = [8, 8], strides = [1, 1]} : vector<8x96xf32> to vector<8x8xf32>
    %71 = arith.truncf %70 : vector<8x8xf32> to vector<8x8xbf16>
    %c0_45 = arith.constant 0 : index
    %c2_46 = arith.constant 2 : index
    %c0_47 = arith.constant 0 : index
    %c0_48 = arith.constant 0 : index
    %72 = vector.load %arg9[%c0_45, %c2_46, %c0_47, %c0_48] : memref<1x4x8x8xbf16, #tpu.memory_space<vmem>>, vector<1x1x8x8xbf16>
    %73 = vector.shape_cast %72 : vector<1x1x8x8xbf16> to vector<8x8xbf16>
    %74 = vector.shape_cast %71 : vector<8x8xbf16> to vector<1x1x8x8xbf16>
    tpu.vector_store %arg9[%c0_45, %c2_46, %c0_47, %c0_48], %74 {strides = array<i32>} : memref<1x4x8x8xbf16, #tpu.memory_space<vmem>>, vector<1x1x8x8xbf16>,
    %75 = vector.extract_strided_slice %29 {offsets = [0, 24], sizes = [8, 8], strides = [1, 1]} : vector<8x96xf32> to vector<8x8xf32>
    %76 = arith.truncf %75 : vector<8x8xf32> to vector<8x8xbf16>
    %c0_49 = arith.constant 0 : index
    %c3 = arith.constant 3 : index
    %c0_50 = arith.constant 0 : index
    %c0_51 = arith.constant 0 : index
    %77 = vector.load %arg7[%c0_49, %c3, %c0_50, %c0_51] : memref<1x4x8x8xbf16, #tpu.memory_space<vmem>>, vector<1x1x8x8xbf16>
    %78 = vector.shape_cast %77 : vector<1x1x8x8xbf16> to vector<8x8xbf16>
    %79 = vector.shape_cast %76 : vector<8x8xbf16> to vector<1x1x8x8xbf16>
    tpu.vector_store %arg7[%c0_49, %c3, %c0_50, %c0_51], %79 {strides = array<i32>} : memref<1x4x8x8xbf16, #tpu.memory_space<vmem>>, vector<1x1x8x8xbf16>,
    %80 = vector.extract_strided_slice %29 {offsets = [0, 56], sizes = [8, 8], strides = [1, 1]} : vector<8x96xf32> to vector<8x8xf32>
    %81 = arith.truncf %80 : vector<8x8xf32> to vector<8x8xbf16>
    %c0_52 = arith.constant 0 : index
    %c3_53 = arith.constant 3 : index
    %c0_54 = arith.constant 0 : index
    %c0_55 = arith.constant 0 : index
    %82 = vector.load %arg8[%c0_52, %c3_53, %c0_54, %c0_55] : memref<1x4x8x8xbf16, #tpu.memory_space<vmem>>, vector<1x1x8x8xbf16>
    %83 = vector.shape_cast %82 : vector<1x1x8x8xbf16> to vector<8x8xbf16>
    %84 = vector.shape_cast %81 : vector<8x8xbf16> to vector<1x1x8x8xbf16>
    tpu.vector_store %arg8[%c0_52, %c3_53, %c0_54, %c0_55], %84 {strides = array<i32>} : memref<1x4x8x8xbf16, #tpu.memory_space<vmem>>, vector<1x1x8x8xbf16>,
    %85 = vector.extract_strided_slice %29 {offsets = [0, 88], sizes = [8, 8], strides = [1, 1]} : vector<8x96xf32> to vector<8x8xf32>
    %86 = arith.truncf %85 : vector<8x8xf32> to vector<8x8xbf16>
    %c0_56 = arith.constant 0 : index
    %c3_57 = arith.constant 3 : index
    %c0_58 = arith.constant 0 : index
    %c0_59 = arith.constant 0 : index
    %87 = vector.load %arg9[%c0_56, %c3_57, %c0_58, %c0_59] : memref<1x4x8x8xbf16, #tpu.memory_space<vmem>>, vector<1x1x8x8xbf16>
    %88 = vector.shape_cast %87 : vector<1x1x8x8xbf16> to vector<8x8xbf16>
    %89 = vector.shape_cast %86 : vector<8x8xbf16> to vector<1x1x8x8xbf16>
    tpu.vector_store %arg9[%c0_56, %c3_57, %c0_58, %c0_59], %89 {strides = array<i32>} : memref<1x4x8x8xbf16, #tpu.memory_space<vmem>>, vector<1x1x8x8xbf16>,
    return
  }
  func.func @transform_0(%arg0: i32, %arg1: i32) -> (i32, i32, i32) {
    %c0_i32 = arith.constant 0 : i32
    %c0_i32_0 = arith.constant 0 : i32
    return %arg0, %arg1, %c0_i32 : i32, i32, i32
  }
  func.func @transform_1(%arg0: i32, %arg1: i32) -> (i32, i32) {
    %c0_i32 = arith.constant 0 : i32
    %c0_i32_0 = arith.constant 0 : i32
    %c0_i32_1 = arith.constant 0 : i32
    return %c0_i32, %c0_i32_0 : i32, i32
  }
  func.func @transform_2(%arg0: i32, %arg1: i32) -> (i32, i32) {
    %c0_i32 = arith.constant 0 : i32
    %c0_i32_0 = arith.constant 0 : i32
    %c0_i32_1 = arith.constant 0 : i32
    return %c0_i32, %c0_i32_0 : i32, i32
  }
  func.func @transform_3(%arg0: i32, %arg1: i32) -> (i32, i32) {
    %c0_i32 = arith.constant 0 : i32
    %c0_i32_0 = arith.constant 0 : i32
    %c0_i32_1 = arith.constant 0 : i32
    return %c0_i32, %c0_i32_0 : i32, i32
  }
  func.func @transform_4(%arg0: i32, %arg1: i32) -> (i32, i32) {
    %c0_i32 = arith.constant 0 : i32
    %c0_i32_0 = arith.constant 0 : i32
    %c0_i32_1 = arith.constant 0 : i32
    return %c0_i32, %c0_i32_0 : i32, i32
  }
  func.func @transform_5(%arg0: i32, %arg1: i32) -> (i32, i32, i32, i32) {
    %c0_i32 = arith.constant 0 : i32
    %c0_i32_0 = arith.constant 0 : i32
    %c0_i32_1 = arith.constant 0 : i32
    return %arg0, %c0_i32, %arg1, %c0_i32_0 : i32, i32, i32, i32
  }
  func.func @transform_6(%arg0: i32, %arg1: i32) -> (i32, i32, i32, i32) {
    %c0_i32 = arith.constant 0 : i32
    %c0_i32_0 = arith.constant 0 : i32
    %c0_i32_1 = arith.constant 0 : i32
    return %arg0, %c0_i32, %arg1, %c0_i32_0 : i32, i32, i32, i32
  }
  func.func @transform_7(%arg0: i32, %arg1: i32) -> (i32, i32, i32, i32) {
    %c0_i32 = arith.constant 0 : i32
    %c0_i32_0 = arith.constant 0 : i32
    %c0_i32_1 = arith.constant 0 : i32
    return %arg0, %c0_i32, %arg1, %c0_i32_0 : i32, i32, i32, i32
  }
}

</mosaic_0001>

<bundles_post_ra>
// kernel: tpu_custom_call.1
= control target key start
LH: loop header
LB: loop body
LE: loop exit
PB: predicated region body
PF: predicated region fallthrough
CT: control target
= control target key end

     0   :  { %s1433_s0 = inlined_call_operand.hbm [shape: f32[2,8,32], index: 0, kind: input, shape index: {}]   ;;  %s1434_s1 = inlined_call_operand.hbm [shape: f32[1,32], index: 1, kind: input, shape index: {}]   ;;  %s1435_s2 = inlined_call_operand.vmem [shape: f32[1,32], index: 2, kind: input, shape index: {}]   ;;  %s1436_s3 = inlined_call_operand.hbm [shape: bf16[32,96], index: 3, kind: input, shape index: {}]   ;;  %s1437_s4 = inlined_call_operand.vmem [shape: f32[1,96], index: 4, kind: input, shape index: {}]   ;;  %s1438_s5 = inlined_call_operand.hbm [shape: bf16[2,4,8,8], index: 5, kind: output, shape index: {0}]   ;;  %s1439_s6 = inlined_call_operand.hbm [shape: bf16[2,4,8,8], index: 6, kind: output, shape index: {1}]   ;;  %s1440_s7 = inlined_call_operand.hbm [shape: bf16[2,4,8,8], index: 7, kind: output, shape index: {2}]  }
   0x1   :  { %1444 = sst [smem:[#allocation16_spill]] %s1433_s0 }
   0x2   :  { %1445 = sst [smem:[#allocation17_spill]] %s1434_s1 }
   0x3   :  { %1446 = sst [smem:[#allocation18_spill]] %s1435_s2 }
   0x4   :  { %1447 = sst [smem:[#allocation19_spill]] %s1436_s3 }
   0x5   :  { %13 = vsyncpa [#allocation3], 0 }
   0x6   :  { %15 = vsyncpa [#allocation3 + $0x1], 0 }
   0x7   :  { %16 = vsyncpa [#allocation6], 0 }
   0x8   :  { %17 = vsyncpa [#allocation4], 0 }
   0x9   :  { %19 = vsyncpa [#allocation4 + $0x1], 0 }
   0xa   :  { %20 = vsyncpa [#allocation10], 0 }
   0xb   :  { %22 = vsyncpa [#allocation10 + $0x1], 0  ;;  %s1194_s24 = smov 0   ;;  %s1196_s25 = smov 0  }
   0xc   :  { %s1198_s26 = smov 0   ;;  %s1200_s27 = smov 0  }
   0xd   :  { %s1202_s28 = smov 0   ;;  %s1204_s29 = smov 0  }
   0xe LB: > { %s1225_s30 = sadd.s32 4294967295, %s1135_s29   ;;  %s1441_s8 = sadd.s32 4294967294, %s1135_s29   ;;  %s1135_s29 = sphi %s1204_s29, %s28_s29   ;;  %s1131_s28 = sphi %s1202_s28, %s1462_s28   ;;  %s1127_s27 = sphi %s1200_s27, %s1461_s27   ;;  %s1123_s26 = sphi %s1198_s26, %s1460_s26   ;;  %s1119_s25 = sphi %s1196_s25, %s1459_s25   ;;  %s1115_s24 = sphi %s1194_s24, %s1458_s24  }
   0xf   : > { %p62_p0 = scmp.ne.s32.totalorder %s1119_s25, %s1115_s24  ;;  %p63_p1 = scmp.eq.s32.totalorder %s1225_s30, 0 }
  0x10   : > { %p178_p2 = scmp.eq.s32.totalorder %s1441_s8, 1  ;;  %p737_p4 = scmp.ge.s32.totalorder %s1135_s29, 1 }
  0x11   : > { %p1235_p3 = por %p63_p1, %p62_p0  ;;  %p241_p6 = scmp.lt.s32.totalorder %s1135_s29, 3 }
  0x12   : > { %p1240_p5 = por %p178_p2, %p62_p0  ;;  %s1450_s1 = sld [smem:[#allocation17_spill]] }
  0x13   : > { %p1248_p7 = pnand %p737_p4, %p241_p6  ;;  %p740_p8 = scmp.ge.s32.totalorder %s1135_s29, 2 }
  0x14   : > { %s1137_s15 = smov [#allocation5]   ;;  %s1452_s3 = sld [smem:[#allocation19_spill]] }
  0x15   : > { %p800_p9 = pneg %p1248_p7  ;;  %s255_s16 = sshll.u32 %s1137_s15, 4  ;;  %s256_s16 = int_to_ptr.vmem [resolvable:$true] %s255_s16 }
  0x16   : > { %s1138_s20 = smov [#allocation7]   ;;  %s1139_s22 = smov 64  }
  0x17   : > { %p801_p10 = pnand %p800_p9, %p63_p1  ;;  %s269_s21 = sshll.u32 %s1138_s20, 4  ;;  %s270_s21 = int_to_ptr.vmem [resolvable:$true] %s269_s21 }
  0x18   : > { %s253_s13 = sshll.u32 %s1450_s1, 4  ;;  %s1140_s23 = smov 4   ;;  %s254_s13 = int_to_ptr.hbm [resolvable:$true] %s253_s13 }
  0x19   : > { %803 = dma.hbm_to_vmem [thread:$0]  (!%p801_p10), %s254_s13, 16, %s256_s16, [#allocation6]  }
  0x1a   : > { %s267_s19 = sshll.u32 %s1452_s3, 4  ;;  %p172_p11 = scmp.eq.s32.totalorder %s1225_s30, 1  ;;  %s268_s19 = int_to_ptr.hbm [resolvable:$true] %s267_s19 }
  0x1b   : > { %806 = dma.hbm_to_vmem [thread:$0]  (!%p801_p10), %s268_s19, 256, %s270_s21, [#allocation6], %s1139_s22, %s1139_s22, %s1140_s23  }
  0x1c   : > { %s40_s11 = sadd.s32 1, %s1131_s28  ;;  %s49_s12 = sadd.s32 1, %s1123_s26 }
  0x1d   : > { %p42_p12 = scmp.ge.s32.totalorder %s40_s11, 2  ;;  %p56_p13 = scmp.ne.s32.totalorder %s1123_s26, %s1119_s25 }
  0x1e   : > { %p57_p0 = scmp.eq.s32.totalorder %s1135_s29, 0  ;;  %p823_p4 = scmp.lt.s32.totalorder %s1135_s29, 2 }
  0x1f   : > { %s1464_s11 = smov (%p42_p12, %s40_s11), 0  ;;  %p1268_p2 = por %p172_p11, %p56_p13 }
  0x20   : > { %s44_s13 = ssub.s32 %s1131_s28, %s1464_s11  ;;  %s286_s16 = sand.u32 1, %s1123_s26  }
  0x21   : > { %p47_p6 = scmp.eq.s32.totalorder %s44_s13, 0  ;;  %p58_p9 = por %p57_p0, %p56_p13 }
  0x22   : > { %s741_s17 = sshll.u32 %s286_s16, 3  ;;  %s742_s18 = sshll.u32 %s1131_s28, 3 }
  0x23   : > { %s1278_s19 = scalar_select %p47_p6, %s1123_s26, %s49_s12  }
  0x24   : > { %s1454_s0 = sld [smem:[#allocation16_spill]]  ;;  %s290_s8 = scalar_lea.vmem [#allocation2], %s741_s17 }
  0x25   : > { %s299_s1 = sshll.u32 %s290_s8, 4  ;;  %p808_p10 = pnand %p823_p4, %p58_p9  ;;  %s300_s1 = int_to_ptr.vmem [resolvable:$true] %s299_s1 }
  0x26   : > { %s287_s3 = scalar_lea.sflag [#allocation3], %s286_s16  ;;  %s1288_s12 = sand.u32 (!%p1248_p7), 1, %s1119_s25  }
  0x27   : > { %s744_s13 = sshll.u32 (!%p1248_p7), %s1288_s12, 3 }
  0x28   : > { %308 = sbr.rel (%p1248_p7) target bundleno = 608 (0x260), region = 40  ;;  %s314_s20 = scalar_lea.vmem (!%p1248_p7), [#allocation2], %s744_s13 }
  0x2a   : > { %s295_s22 = scalar_lea.hbm %s1454_s0, %s742_s18  ;;  %s311_s18 = scalar_lea.sflag (!%p1248_p7), [#allocation3], %s1288_s12 }
  0x2b   : > { %s297_s23 = sshll.u32 %s295_s22, 4  ;;  %s298_s23 = int_to_ptr.hbm [resolvable:$true] %s297_s23 }
  0x2c   : > { %810 = dma.hbm_to_vmem [thread:$0]  (!%p808_p10), %s298_s23, 128, %s300_s1, %s287_s3  }
  0x2d   : > { %1098 = dma.done.wait (%p1235_p3), %s311_s18, 128  }
  0x2e   : > { %1100 = vsyncadd (%p1235_p3), %s311_s18, 4294967168 }
  0x2f   : > { %1102 = dma.done.wait (%p63_p1), [#allocation6], 272  }
  0x30   : > { %1104 = vsyncadd (%p63_p1), [#allocation6], 4294967024  ;;  %vm368_vm0 = vcmask 261120   ;;  %v367_v0 = vld [vmem:[%s314_s20] sm:$0xff]  ;;  %v1141_v2 = vmov 32.0   ;;  %v779_v15 = vld [vmem:[#allocation7] sm:$0xff] }
  0x31   : > { %v369_v1 = vsel %vm368_vm0, %v367_v0, 0.0  ;;  %895 = vrcp.f32 %v1141_v2  ;;  %v780_v14 = vld [vmem:[#allocation7 + $0x8] sm:$0xff]  ;;  %v892_v25 = vld [vmem:[#allocation5] ss:$0 sm:$0xff]  ;;  %s1455_s2 = sld [smem:[#allocation18_spill]]  ;;  %s1310_s14 = sshll.u32 %s1288_s12, 4 }
  0x32   : > { %370 = vadd.xlane.f32.xlu0 %v369_v1  ;;  %438 = vmatpush.bf16.msra.mxu0 %v780_v14  ;;  %v894_v32 = vld [vmem:[%s1437_s4] ss:$0 sm:$0xff]  ;;  %vm446_vm5 = vcmask 60416   ;;  %s1442_s16 = smov 64   ;;  %s1143_s17 = smov 80  }
  0x33   : > { %s1314_s21 = scalar_lea.vmem [#allocation8], %s1310_s14  ;;  %s1144_s22 = smov 96  }
  0x34   : > { %s1145_s23 = smov 72   ;;  %s1146_s13 = smov 88  }
  0x35   : > { %s1147_s18 = smov 56   ;;  %s1148_s20 = smov 120  }
  0x36   : > { %439 = vmatpush.bf16.msra.mxu0 %v779_v15  ;;  %s1149_s1 = smov 48   ;;  %s1150_s3 = smov 112  }
  0x37   : > { %v896_v3 = vpop.eup %895  ;;  %v893_v28 = vld [vmem:[%s1455_s2] ss:$0 sm:$0xff]  ;;  %s1151_s8 = smov 40   ;;  %s1152_s9 = smov 104  }
  0x38   : > { %v373_v4 = vmul.f32 32.0, %v896_v3  ;;  %vm377_vm1 = vweird.f32 %v896_v3 }
  0x3a   : > { %v374_v5 = vsub.f32 1.0, %v373_v4 }
  0x3c   : > { %v375_v6 = vmul.f32 %v896_v3, %v374_v5 }
  0x3e   : > { %v376_v7 = vadd.f32 %v896_v3, %v375_v6 }
  0x40   : > { %v378_v8 = vsel %vm377_vm1, %v896_v3, %v376_v7 }
  0xa5   : > { %v371_v9 = vpop.xlane.xlu0 %370 }
  0xa6   : > { %v379_v10 = vmul.f32 %v378_v8, %v371_v9 }
  0xa8   : > { %v380_v11 = vsub.f32 %v367_v0, %v379_v10 }
  0xaa   : > { %v381_v12 = vmul.f32 %v380_v11, %v380_v11 }
  0xac   : > { %v382_v13 = vsel %vm368_vm0, %v381_v12, 0.0 }
  0xad   : > { %383 = vadd.xlane.f32.xlu0 %v382_v13 }
 0x120   : > { %v384_v16 = vpop.xlane.xlu0 %383 }
 0x121   : > { %v385_v17 = vmul.f32 %v384_v16, %v378_v8 }
 0x123   : > { %v386_v18 = vadd.f32 1e-05, %v385_v17 }
 0x125   : > { %897 = vrsqrt.f32 %v386_v18  ;;  %vm393_vm3 = vweird.f32 %v386_v18 }
 0x12b   : > { %v898_v19 = vpop.eup %897 }
 0x12c   : > { %v388_v20 = vmul.f32 %v898_v19, %v386_v18  ;;  %vm394_vm2 = vweird.f32 %v898_v19 }
 0x12d   : > { %vm395_vm4 = vmor %vm393_vm3, %vm394_vm2 }
 0x12e   : > { %v389_v21 = vmul.f32 %v898_v19, %v388_v20 }
 0x130   : > { %v390_v22 = vmul.f32 0.5, %v389_v21 }
 0x132   : > { %v391_v23 = vsub.f32 1.5, %v390_v22 }
 0x134   : > { %v392_v24 = vmul.f32 %v898_v19, %v391_v23 }
 0x136   : > { %v396_v26 = vsel %vm395_vm4, %v898_v19, %v392_v24 }
 0x137   : > { %v397_v27 = vmul.f32 %v396_v26, %v380_v11 }
 0x139   : > { %v402_v29 = vmul.f32 %v892_v25, %v397_v27 }
 0x13b   : > { %v407_v30 = vadd.f32 %v893_v28, %v402_v29 }
 0x13d   : > { %v408_v31 = vpack.c.bf16 %v407_v30, %v407_v30 }
 0x13f   : > { %758 = vmatmul.msk.bf16.vlgmr.msra.gmra.mxu0 %vm368_vm0, %v408_v31 }
 0x1bc   : > { %v441_v33 = vpop.f32.mrf.mxu0 }
 0x1bd   : > { %v442_v34 = vadd.f32 %v894_v32, %v441_v33 }
 0x1bf   : > { %v445_v35 = vpack.c.bf16 %v442_v34, %v442_v34 }
 0x1c1   : > { %453 = vrot.lane.b32.xlu0 %v445_v35, %s1442_s16  ;;  %477 = vrot.lane.b32.xlu2 %v445_v35, %s1143_s17  ;;  %447 = vst.msk [vmem:[%s1314_s21] sm:$0xf] %vm446_vm5, %v445_v35  ;;  %s358_s17 = scalar_lea.vmem [#allocation9], %s1310_s14 }
 0x1c2   : > { %449 = vrot.lane.b32.xlu1 %v445_v35, %s1144_s22  ;;  %s365_s22 = scalar_lea.vmem [#allocation11], %s1310_s14 }
 0x1c3   : > { %s562_s16 = sshll.u32 %s365_s22, 4  ;;  %s1343_s16 = int_to_ptr.vmem [resolvable:$true] %s562_s16 }
 0x1c4   : > { %v443_v36 = vpop.f32.mrf.mxu0 }
 0x1c9   : > { %492 = vrot.lane.b32.xlu2 %v445_v35, %s1145_s23  ;;  %s1324_s23 = sshll.u32 %s1127_s27, 4 }
 0x1ca   : > { %462 = vrot.lane.b32.xlu1 %v445_v35, %s1146_s13  ;;  %s561_s27 = scalar_lea.hbm %s1440_s7, %s1324_s23 }
 0x1cb   : > { %s1340_s0 = sshll.u32 %s561_s27, 4  ;;  %s565_s0 = int_to_ptr.hbm [resolvable:$true] %s1340_s0 }
 0x1d1   : > { %467 = vrot.lane.b32.xlu2 %v445_v35, %s1147_s18 }
 0x1d2   : > { %457 = vrot.lane.b32.xlu1 %v445_v35, %s1148_s20  ;;  %s543_s20 = scalar_lea.hbm %s1439_s6, %s1324_s23 }
 0x1d9   : > { %482 = vrot.lane.b32.xlu2 %v445_v35, %s1149_s1  ;;  %s1009_s1 = scalar_lea.hbm %s1439_s6, 32 }
 0x1da   : > { %472 = vrot.lane.b32.xlu1 %v445_v35, %s1150_s3  ;;  %s544_s3 = sshll.u32 %s358_s17, 4  ;;  %s545_s3 = int_to_ptr.vmem [resolvable:$true] %s544_s3 }
 0x1e1   : > { %497 = vrot.lane.b32.xlu2 %v445_v35, %s1151_s8  ;;  %s507_s8 = sand.u32 1, %s1225_s30  }
 0x1e2   : > { %487 = vrot.lane.b32.xlu1 %v445_v35, %s1152_s9  ;;  %s1338_s9 = sshll.u32 %s543_s20, 4  ;;  %s1348_s30 = scalar_lea.sflag [#allocation10], %s507_s8  ;;  %s547_s9 = int_to_ptr.hbm [resolvable:$true] %s1338_s9 }
 0x1e3   : > { %s1003_s13 = sshra.s32 %s547_s9, 4  ;;  %s1004_s13 = int_to_ptr.hbm [resolvable:$true] %s1003_s13 }
 0x1e4   : > { %s1005_s18 = scalar_lea.hbm %s1004_s13, 16  ;;  %p1010_p11 = scmp.lt.s32.totalorder %s1004_s13, %s1439_s6 }
 0x1e5   : > { %p1006_p1 = scmp.ne.s32.totalorder %s1004_s13, %s1005_s18  ;;  %p1011_p12 = scmp.lt.s32.totalorder %s1009_s1, %s1005_s18 }
 0x1e7   : > { %p1007_p3 = pnand %p1006_p1, %p1268_p2  ;;  %p1012_p13 = por %p1011_p12, %p1010_p11 }
 0x1e9   : > { %p1008_p7 = pneg %p1007_p3 }
 0x1eb   : > { %p1013_p0 = pnand %p1012_p13, %p1008_p7 }
 0x21b   : > { %v478_v37 = vpop.permute.xlu2 %477 }
 0x21c   : > { %763 = vst.msk [vmem:[%s358_s17 + $0x8] sm:$0xf] %vm446_vm5, %v478_v37 }
 0x223   : > { %v493_v38 = vpop.permute.xlu2 %492 }
 0x224   : > { %766 = vst.msk [vmem:[%s358_s17 + $0xc] sm:$0xf] %vm446_vm5, %v493_v38 }
 0x22b   : > { %v468_v39 = vpop.permute.xlu2 %467 }
 0x22c   : > { %761 = vst.msk [vmem:[%s365_s22 + $0x4] sm:$0xf] %vm446_vm5, %v468_v39 }
 0x233   : > { %v454_v40 = vpop.permute.xlu0 %453  ;;  %v483_v41 = vpop.permute.xlu2 %482 }
 0x234   : > { %456 = vst.msk [vmem:[%s365_s22] sm:$0xf] %vm446_vm5, %v454_v40  ;;  %v450_v42 = vpop.permute.xlu1 %449 }
 0x235   : > { %764 = vst.msk [vmem:[%s365_s22 + $0x8] sm:$0xf] %vm446_vm5, %v483_v41 }
 0x236   : > { %452 = vst.msk [vmem:[%s358_s17] sm:$0xf] %vm446_vm5, %v450_v42 }
 0x23b   : > { %v498_v43 = vpop.permute.xlu2 %497 }
 0x23c   : > { %767 = vst.msk [vmem:[%s365_s22 + $0xc] sm:$0xf] %vm446_vm5, %v498_v43  ;;  %v463_v44 = vpop.permute.xlu1 %462 }
 0x23d   : > { %760 = vst.msk [vmem:[%s358_s17 + $0x4] sm:$0xf] %vm446_vm5, %v463_v44 }
 0x23e   : > { %1016 = shalt.err (!%p1013_p0)
}
 0x23f   : > { %s1153_s17 = smov 4   ;;  %s1456_s22 = smov 64  }
 0x240   : > { %795 = dma.vmem_to_hbm [thread:$0]  (%p1268_p2), %s545_s3, 256, %s547_s9, %s1348_s30, %s1456_s22, %s1456_s22, %s1153_s17  }
 0x241   : > { %s1031_s8 = sshra.s32 %s565_s0, 4  ;;  %s1037_s18 = scalar_lea.hbm %s1440_s7, 32  ;;  %s1032_s8 = int_to_ptr.hbm [resolvable:$true] %s1031_s8 }
 0x242   : > { %s1033_s20 = scalar_lea.hbm %s1032_s8, 16  ;;  %p1038_p10 = scmp.lt.s32.totalorder %s1032_s8, %s1440_s7 }
 0x243   : > { %p1034_p4 = scmp.ne.s32.totalorder %s1032_s8, %s1033_s20  ;;  %p1039_p1 = scmp.lt.s32.totalorder %s1037_s18, %s1033_s20 }
 0x245   : > { %p1035_p6 = pnand %p1034_p4, %p1268_p2  ;;  %p1040_p3 = por %p1039_p1, %p1038_p10 }
 0x247   : > { %p1036_p9 = pneg %p1035_p6 }
 0x249   : > { %p1041_p7 = pnand %p1040_p3, %p1036_p9 }
 0x24b   : > { %1044 = shalt.err (!%p1041_p7)
}
 0x24c   : > { %796 = dma.vmem_to_hbm [thread:$0]  (%p1268_p2), %s1343_s16, 256, %s565_s0, %s1348_s30, %s1456_s22, %s1456_s22, %s1153_s17   ;;  %v458_v45 = vpop.permute.xlu1 %457 }
 0x24d   : > { %759 = vst.msk [vmem:[%s1314_s21 + $0x4] sm:$0xf] %vm446_vm5, %v458_v45  ;;  %s525_s27 = scalar_lea.hbm %s1438_s5, %s1324_s23  ;;  %s526_s8 = sshll.u32 %s1314_s21, 4  ;;  %s527_s8 = int_to_ptr.vmem [resolvable:$true] %s526_s8 }
 0x24e   : > { %s528_s20 = sshll.u32 %s525_s27, 4  ;;  %s503_s2 = scalar_lea.sflag [#allocation4], %s1288_s12  ;;  %s529_s20 = int_to_ptr.hbm [resolvable:$true] %s528_s20 }
 0x24f   : > { %s1059_s0 = sshra.s32 %s529_s20, 4  ;;  %s1065_s18 = scalar_lea.hbm %s1438_s5, 32  ;;  %s1060_s0 = int_to_ptr.hbm [resolvable:$true] %s1059_s0 }
 0x250   : > { %s1061_s16 = scalar_lea.hbm %s1060_s0, 16  ;;  %p1066_p0 = scmp.lt.s32.totalorder %s1060_s0, %s1438_s5 }
 0x251   : > { %p1062_p11 = scmp.ne.s32.totalorder %s1060_s0, %s1061_s16  ;;  %p1067_p4 = scmp.lt.s32.totalorder %s1065_s18, %s1061_s16 }
 0x253   : > { %p1063_p12 = pnand %p1062_p11, %p1268_p2  ;;  %p1068_p6 = por %p1067_p4, %p1066_p0 }
 0x254   : > { %v473_v46 = vpop.permute.xlu1 %472 }
 0x255   : > { %762 = vst.msk [vmem:[%s1314_s21 + $0x8] sm:$0xf] %vm446_vm5, %v473_v46  ;;  %p1064_p13 = pneg %p1063_p12 }
 0x257   : > { %p1069_p9 = pnand %p1068_p6, %p1064_p13 }
 0x25c   : > { %v488_v47 = vpop.permute.xlu1 %487 }
 0x25d   : > { %765 = vst.msk [vmem:[%s1314_s21 + $0xc] sm:$0xf] %vm446_vm5, %v488_v47 }
 0x25e   : > { %1072 = shalt.err (!%p1069_p9)
}
 0x25f   : > { %794 = dma.vmem_to_hbm [thread:$0]  (%p1268_p2), %s527_s8, 256, %s529_s20, %s503_s2, %s1456_s22, %s1456_s22, %s1153_s17  }
 0x260 PF: > { %s579_s12 = sand.u32 1, %s1115_s24   ;;  %p812_p10 = pnand %p740_p8, %p1240_p5 }
 0x261   : > { %s580_s21 = scalar_lea.sflag [#allocation4], %s579_s12 }
 0x262   : > { %p813_p1 = pneg %p812_p10 }
 0x264   : > { %1106 = dma.done.wait (%p813_p1), %s580_s21, 256  }
 0x265   : > { %1108 = vsyncadd (%p813_p1), %s580_s21, 4294967040  ;;  %s1457_s1 = sadd.s32 4294967294, %s1135_s29  }
 0x266   : > { %s589_s3 = sand.u32 1, %s1457_s1  }
 0x267   : > { %s590_s15 = scalar_lea.sflag [#allocation10], %s589_s3 }
 0x268   : > { %1110 = dma.done.wait (%p813_p1), %s590_s15, 512  }
 0x269   : > { %1112 = vsyncadd (%p813_p1), %s590_s15, 4294966784  ;;  %s28_s29 = sadd.s32 1, %s1135_s29   ;;  %s1458_s24 = smov %s1119_s25 }
 0x26a   : > { %p25_p2 = scmp.ge.s32.totalorder %s28_s29, 4   ;;  %s1459_s25 = smov %s1123_s26 }
 0x26b   : > { %s1460_s26 = smov %s1278_s19  ;;  %s1461_s27 = smov %s1131_s28 }
 0x26c   : > { %s1462_s28 = smov %s1464_s11  ;;  %27 = sbr.rel (!%p25_p2) target bundleno = 14 (0xe), region = 134 }
 0x271   :  { %606 = vsyncpa [#allocation3], 1 }
 0x272   :  { %608 = vsyncpa [#allocation3 + $0x1], 1 }
 0x273   :  { %609 = vsyncpa [#allocation6], 1 }
 0x274   :  { %610 = vsyncpa [#allocation4], 1 }
 0x275   :  { %612 = vsyncpa [#allocation4 + $0x1], 1 }
 0x276   :  { %613 = vsyncpa [#allocation10], 1 }
 0x277   :  { %615 = vsyncpa [#allocation10 + $0x1], 1 }

</bundles_post_ra>
